<compile_context>
chip_gen: v7x
topology: tpu7x:2x2x1
jax: 0.10.0
libtpu: 0.0.40
codegen_flags: <defaults>
</compile_context>

<pallas_src>
import jax
import jax.numpy as jnp
from jax import lax
from jax.experimental import pallas as pl
from jax.experimental.pallas import tpu as pltpu


_LANE = 128  # vreg lane width: node-tile granularity for the transposed x


def _round_up(x, m):
    return ((x + m - 1) // m) * m


def _laplacian_pe_kernel(xT_ref, w_ref, b_ref, o_ref):
    # xT_ref: (K, TM)  lap_mx tile, nodes on the lane (minor) axis (moving)
    # w_ref : (E, K)   Linear weight, pinned across the grid
    # b_ref : (1, E)   Linear bias, pinned across the grid
    # o_ref : (TM, E)  output tile (moving)
    #
    # y = x @ W^T + b: contract K (dim 0 of x^T with dim 1 of W) on the MXU,
    # accumulate in f32, add bias in f32, single cast on store.
    acc = lax.dot_general(
        xT_ref[...], w_ref[...],
        dimension_numbers=(((0,), (1,)), ((), ())),
        preferred_element_type=jnp.float32,
    )
    o_ref[...] = (acc + b_ref[...].astype(jnp.float32)).astype(o_ref.dtype)


def laplacian_pe_from_transposed(lap_mx_t, weight, bias, *, tm=4096):
    """Core entry point.

    lap_mx_t: (lape_dim, N)   -- nodes on the minor axis (lane-dense reads)
    weight  : (embed_dim, lape_dim)
    bias    : (embed_dim,)
    returns : (1, 1, N, embed_dim), matching the PyTorch module.
    """
    k, n = lap_mx_t.shape
    e, kw = weight.shape
    assert k == kw, (k, kw)
    dtype = lap_mx_t.dtype
    itemsize = jnp.dtype(dtype).itemsize

    # Node tile: either the full extent (small graphs, single step) or a
    # multiple of 128 (lane granularity of the x^T tile).  For graphs larger
    # than one lane-tile, aim for >= 2 balanced grid steps so a v7x megacore
    # can shard the row tiles across both TensorCores.  No explicit padding:
    # grid = cdiv(n, tm_eff); Pallas clips/masks the partial last block, and
    # the garbage lanes it computes never reach HBM (rows are independent).
    if n <= _LANE:
        tm_eff = n
    else:
        tm_cap = max(_LANE, _round_up(min(tm, n), _LANE))
        half = _round_up(pl.cdiv(n, 2), _LANE)
        tm_eff = min(tm_cap, half)
    grid = (pl.cdiv(n, tm_eff),)

    b2d = bias.reshape(1, e)

    # Physical traffic estimate: x reads are lane-dense now; the output HBM
    # layout is lane-padded to a multiple of 128 regardless of embed_dim.
    e_phys = _round_up(e, _LANE)
    cost = pl.CostEstimate(
        flops=2 * n * k * e,
        transcendentals=0,
        bytes_accessed=(n * k + e * k + e + n * e_phys) * itemsize,
    )

    out = pl.pallas_call(
        _laplacian_pe_kernel,
        out_shape=jax.ShapeDtypeStruct((n, e), dtype),
        grid_spec=pl.GridSpec(
            grid=grid,
            in_specs=[
                pl.BlockSpec((k, tm_eff), lambda i: (0, i)),  # x^T tile (moving)
                pl.BlockSpec((e, k), lambda i: (0, 0)),       # weight (pinned)
                pl.BlockSpec((1, e), lambda i: (0, 0)),       # bias (pinned)
            ],
            out_specs=pl.BlockSpec((tm_eff, e), lambda i: (i, 0)),
        ),
        compiler_params=pltpu.CompilerParams(
            dimension_semantics=("parallel",)),
        cost_estimate=cost,
    )(lap_mx_t, weight, b2d)

    # unsqueeze(0).unsqueeze(0)
    return out.reshape(1, 1, n, e)


def laplacian_pe(lap_mx, weight, bias, *, tm=4096):
    """Module-faithful wrapper: lap_mx is (N, lape_dim) like the PyTorch code.

    # TODO(synk): hoist this transpose into data preparation (store the
    # Laplacian PE matrix as (lape_dim, N) once, outside the forward pass);
    # doing it per call re-reads the lane-padded (N, lape_dim) array and gives
    # back part of the bandwidth win.
    """
    return laplacian_pe_from_transposed(lap_mx.T, weight, bias, tm=tm)


if __name__ == "__main__":
    key = jax.random.PRNGKey(0)
    k_x, k_w, k_b, k_x2 = jax.random.split(key, 4)

    lape_dim = 8
    embed_dim = 32

    # Deterministic parameter init mimicking nn.Linear default
    # (uniform within +/- 1/sqrt(fan_in)).
    bound = 1.0 / (lape_dim ** 0.5)
    weight = jax.random.uniform(k_w, (embed_dim, lape_dim),
                                minval=-bound, maxval=bound,
                                dtype=jnp.float32)
    bias = jax.random.uniform(k_b, (embed_dim,),
                              minval=-bound, maxval=bound,
                              dtype=jnp.float32)

    # --- case 1: module-sized input, single full-extent tile ---------------
    n1 = 16
    lap_mx = jax.random.normal(k_x, (n1, lape_dim), dtype=jnp.float32)
    out = jax.block_until_ready(laplacian_pe(lap_mx, weight, bias))
    ref = (lap_mx @ weight.T + bias).reshape(1, 1, n1, embed_dim)
    assert out.shape == (1, 1, n1, embed_dim)
    assert jnp.allclose(out, ref, atol=1e-5, rtol=1e-5)

    # --- case 2: multi-step grid with a partial (masked) last block, fed via
    # the preferred pre-transposed (lape_dim, N) layout -----------------------
    n2 = 300
    lap_mx2 = jax.random.normal(k_x2, (n2, lape_dim), dtype=jnp.float32)
    out2 = jax.block_until_ready(
        laplacian_pe_from_transposed(lap_mx2.T, weight, bias, tm=128))
    ref2 = (lap_mx2 @ weight.T + bias).reshape(1, 1, n2, embed_dim)
    assert out2.shape == (1, 1, n2, embed_dim)
    assert jnp.allclose(out2, ref2, atol=1e-5, rtol=1e-5)

    print("KERNEL_OK")
</pallas_src>

<mosaic_0001>
module attributes {stable_mosaic.version = 11 : i64} {
  func.func @_laplacian_pe_kernel(%arg0: i32, %arg1: memref<8x16xf32, #tpu.memory_space<vmem>>, %arg2: memref<32x8xf32, #tpu.memory_space<vmem>>, %arg3: memref<1x32xf32, #tpu.memory_space<vmem>>, %arg4: memref<16x32xf32, #tpu.memory_space<vmem>>) attributes {dimension_semantics = [#tpu.dimension_semantics<parallel>], iteration_bounds = array<i64: 1>, scalar_prefetch = 0 : i64, scratch_operands = 0 : i64, tpu.core_type = #tpu.core_type<tc>, window_params = [{transform_indices = @transform_0, window_bounds = array<i64: 8, 16>}, {pipeline_mode = #tpu.pipeline_mode<synchronous>, transform_indices = @transform_1, window_bounds = array<i64: 32, 8>}, {pipeline_mode = #tpu.pipeline_mode<synchronous>, transform_indices = @transform_2, window_bounds = array<i64: 1, 32>}, {transform_indices = @transform_3, window_bounds = array<i64: 16, 32>}]} {
    %c0 = arith.constant 0 : index
    %c0_0 = arith.constant 0 : index
    %0 = vector.load %arg1[%c0, %c0_0] : memref<8x16xf32, #tpu.memory_space<vmem>>, vector<8x16xf32>
    %c0_1 = arith.constant 0 : index
    %c0_2 = arith.constant 0 : index
    %1 = vector.load %arg2[%c0_1, %c0_2] : memref<32x8xf32, #tpu.memory_space<vmem>>, vector<32x8xf32>
    %cst = arith.constant dense<0.000000e+00> : vector<16x32xf32>
    %2 = tpu.matmul %0, %1, %cst {dimension_numbers = #tpu.dot_dimension_numbers<[0], [1], [1], [0], [0, 1, 1, 0], [], []>} : vector<8x16xf32>, vector<32x8xf32>, vector<16x32xf32> -> vector<16x32xf32>
    %c0_3 = arith.constant 0 : index
    %c0_4 = arith.constant 0 : index
    %3 = vector.load %arg3[%c0_3, %c0_4] : memref<1x32xf32, #tpu.memory_space<vmem>>, vector<1x32xf32>
    %4 = vector.broadcast %3 : vector<1x32xf32> to vector<16x32xf32>
    %5 = arith.addf %2, %4 : vector<16x32xf32>
    %c0_5 = arith.constant 0 : index
    %c0_6 = arith.constant 0 : index
    %6 = vector.load %arg4[%c0_5, %c0_6] : memref<16x32xf32, #tpu.memory_space<vmem>>, vector<16x32xf32>
    tpu.vector_store %arg4[%c0_5, %c0_6], %5 {strides = array<i32>} : memref<16x32xf32, #tpu.memory_space<vmem>>, vector<16x32xf32>,
    return
  }
  func.func @transform_0(%arg0: i32) -> (i32, i32) {
    %c0_i32 = arith.constant 0 : i32
    %c0_i32_0 = arith.constant 0 : i32
    return %c0_i32, %arg0 : i32, i32
  }
  func.func @transform_1(%arg0: i32) -> (i32, i32) {
    %c0_i32 = arith.constant 0 : i32
    %c0_i32_0 = arith.constant 0 : i32
    %c0_i32_1 = arith.constant 0 : i32
    return %c0_i32, %c0_i32_0 : i32, i32
  }
  func.func @transform_2(%arg0: i32) -> (i32, i32) {
    %c0_i32 = arith.constant 0 : i32
    %c0_i32_0 = arith.constant 0 : i32
    %c0_i32_1 = arith.constant 0 : i32
    return %c0_i32, %c0_i32_0 : i32, i32
  }
  func.func @transform_3(%arg0: i32) -> (i32, i32) {
    %c0_i32 = arith.constant 0 : i32
    %c0_i32_0 = arith.constant 0 : i32
    return %arg0, %c0_i32 : i32, i32
  }
}

</mosaic_0001>

<bundles_post_ra>
// kernel: tpu_custom_call.1
= control target key start
LH: loop header
LB: loop body
LE: loop exit
PB: predicated region body
PF: predicated region fallthrough
CT: control target
= control target key end

     0   :  { %vm59_vm0 = vcmask 64512   ;;  %s289_s0 = inlined_call_operand.vmem [shape: f32[8,16], index: 0, kind: input, shape index: {}]   ;;  %s290_s1 = inlined_call_operand.vmem [shape: f32[32,8], index: 1, kind: input, shape index: {}]   ;;  %s291_s2 = inlined_call_operand.vmem [shape: f32[1,32], index: 2, kind: input, shape index: {}]   ;;  %s292_s3 = inlined_call_operand.hbm [shape: f32[16,32], index: 3, kind: output, shape index: {}]  }
   0x1   :  { %v15_v0 = vld [vmem:[%s289_s0] sm:$0xff]  ;;  %v17_v2 = vld [vmem:[%s290_s1 + $0x8] sm:$0xff]  ;;  %vm197_vm1 = vmpackc.low %vm59_vm0, %vm59_vm0 }
   0x2   :  { %v16_v1 = vld [vmem:[%s290_s1] sm:$0xff]  ;;  %27 = vxpose.xlu0.b32.start.end [1/1] (short) (narrow) %v15_v0, 16  ;;  %v18_v4 = vld [vmem:[%s290_s1 + $0x10] sm:$0xff]  ;;  %v19_v5 = vld [vmem:[%s290_s1 + $0x18] sm:$0xff] }
   0x3   :  { %v196_v3 = vpack.c.bf16 %v17_v2, %v16_v1  ;;  %v202_v6 = vpack.c.bf16 %v19_v5, %v18_v4 }
   0x4   :  { %8 = vsyncpa [#allocation3], 0  ;;  %v172_v9 = vld [vmem:[%s291_s2] ss:$0 sm:$0xff]  ;;  %s236_s23 = smov [#allocation2]   ;;  %vm153_vm2 = vcmask 261120  }
   0x5   :  { %198 = vmatprep.subr.msk.bf16.mxu0 %vm197_vm1, %v196_v3  ;;  %s161_s24 = sshll.u32 %s236_s23, 4  ;;  %s162_s24 = int_to_ptr.vmem [resolvable:$true] %s161_s24 }
   0x6   :  { %201 = vmatpush3.bf16.xpose.msk.msra.mxu0 %vm197_vm1, %v196_v3  ;;  %s212_s1 = scalar_lea.vmem %s162_s24, 256  ;;  %p217_p1 = scmp.lt.s32.totalorder %s162_s24, %s162_s24 }
   0x7   :  { %204 = vmatprep.subr.msk.bf16.mxu0 %vm197_vm1, %v202_v6  ;;  %p213_p0 = scmp.ne.s32.totalorder %s162_s24, %s212_s1  ;;  %p218_p2 = scmp.lt.s32.totalorder %s212_s1, %s212_s1 }
   0x9   :  { %p219_p3 = por %p218_p2, %p217_p1 }
   0xb   :  { %p220_p4 = pnand %p219_p3, %p213_p0 }
   0xe   :  { %207 = vmatpush3.bf16.xpose.msk.msra.mxu0 %vm197_vm1, %v202_v6 }
  0x82   :  { %v43_v7 = vpop.trf.xlu0 }
  0x83   :  { %193 = vmatprep.mubr.msk.f32.mxu0 %vm59_vm0, %v43_v7 }
  0x86   :  { %v44_v8 = vpop.trf.xlu0 }
  0x87   :  { %194 = vmatmul.mubr.msk.f32.vlgmr.msra.gmra.mrb[0].mxu0 %vm59_vm0, %v44_v8 }
 0x15a   :  { %v195_v10 = vpop.f32.mrb[0].mxu0 }
 0x15b   :  { %v150_v11 = vadd.f32 %v195_v10, %v172_v9  ;;  %v144_v12 = vpop.f32.mrb[1].mxu0 }
 0x15c   :  { %v145_v13 = vadd.f32 %v172_v9, %v144_v12 }
 0x15d   :  { %155 = vst.msk [vmem:[#allocation2 + $0x8] sm:$0xff] %vm153_vm2, %v150_v11 }
 0x15e   :  { %154 = vst.msk [vmem:[#allocation2] sm:$0xff] %vm153_vm2, %v145_v13 }
 0x15f   :  { %223 = shalt.err (!%p220_p4)
}
 0x160   :  { %s224_s2 = scalar_lea.hbm %s292_s3, 256 }
 0x161   :  { %p225_p5 = scmp.ne.s32.totalorder %s292_s3, %s224_s2  ;;  %p228_p6 = scmp.lt.u32.totalorder %s224_s2, %s292_s3 }
 0x163   :  { %p230_p7 = pnand %p228_p6, %p225_p5 }
 0x165   :  { %233 = shalt.err (!%p230_p7)
}
 0x166   :  { %s237_s4 = smov 128   ;;  %s238_s5 = smov 8  }
 0x167   :  { %167 = dma.vmem_to_hbm [thread:$0]  %s162_s24, 256, %s292_s3, [#allocation3], %s237_s4, %s237_s4, %s238_s5  }
 0x168   :  { %234 = dma.done.wait [#allocation3], 256  }
 0x169   :  { %235 = vsyncadd [#allocation3], 4294967040 }
 0x16a   :  { %171 = vsyncpa [#allocation3], 1 }

</bundles_post_ra>
